<compile_context>
chip_gen: v7x
topology: tpu7x:2x2x1
jax: 0.10.0
libtpu: 0.0.40
codegen_flags: <defaults>
</compile_context>

<pallas_src>
import functools

import jax
import jax.numpy as jnp
from jax.experimental import pallas as pl
from jax.experimental.pallas import tpu as pltpu


_VMEM_LIMIT_BYTES = 64 << 20       # explicit scoped-VMEM limit (safe on all gens)
_BLOCK_BYTES = 4 << 20             # per-block byte target for the two-pass path
_FUSED_SLAB_BYTES = 4 << 20        # single-pass fused path when C*HW*itemsize <= this


# ---------------------------------------------------------------------------
# Single-pass fused kernel: pool -> cSE MLP -> sSE -> apply, x read once.
# ---------------------------------------------------------------------------
def _scse_fused_kernel(x_ref, w1_ref, b1_ref, w2_ref, b2_ref, ws_ref, bs_ref,
                       o_ref, *, inv_hw):
    x = x_ref[0]                                               # (C, HW), input dtype
    # Spatial sum on the (otherwise idle) MXU, f32 accumulation.
    ones = jnp.ones((x.shape[1], 1), x.dtype)
    pooled = jnp.dot(x, ones, preferred_element_type=jnp.float32) * inv_hw  # (C, 1)
    # cSE MLP (tiny column-vector matmuls), runs once per sample.
    h = jnp.dot(w1_ref[...], pooled,
                preferred_element_type=jnp.float32) + b1_ref[...]           # (Cr, 1)
    h = jnp.maximum(h, 0.0)
    g = jnp.dot(w2_ref[...], h,
                preferred_element_type=jnp.float32) + b2_ref[...]           # (C, 1)
    cse = jax.nn.sigmoid(g)                                                 # (C, 1) f32
    # sSE per-pixel gate (1, HW).
    sse = jax.nn.sigmoid(
        jnp.dot(ws_ref[...], x, preferred_element_type=jnp.float32)
        + bs_ref[...])
    # Fused gating in the input dtype (bf16-native on v6e/v7x); one downcast
    # of each gate, then a single multiply per element.
    gate = cse.astype(x.dtype) + sse.astype(x.dtype)                        # (C, HW)
    o_ref[0] = x * gate


# ---------------------------------------------------------------------------
# Two-pass path, pass 1: per-(split, sample) spatial partial sums on the MXU.
# ---------------------------------------------------------------------------
def _pool_kernel(x_ref, psum_ref, acc_ref):
    t = pl.program_id(2)

    @pl.when(t == 0)
    def _():
        acc_ref[...] = jnp.zeros_like(acc_ref)

    x = x_ref[0]                                               # (C, hw_tile)
    ones = jnp.ones((x.shape[1], 1), x.dtype)
    acc_ref[...] += jnp.dot(x, ones, preferred_element_type=jnp.float32)

    @pl.when(t == pl.num_programs(2) - 1)
    def _():
        psum_ref[0] = acc_ref[...]                             # (C, 1) partial sum


# ---------------------------------------------------------------------------
# Two-pass path, pass 2: out = x * (cSE + sSE), gates fused, lane-dense stores.
# ---------------------------------------------------------------------------
def _apply_kernel(x_ref, gate_ref, ws_ref, bs_ref, o_ref):
    x = x_ref[0]                                               # (C, hw_tile)
    cse = gate_ref[0]                                          # (C, 1) f32
    sse = jax.nn.sigmoid(
        jnp.dot(ws_ref[...], x, preferred_element_type=jnp.float32)
        + bs_ref[...])                                         # (1, hw_tile) f32
    gate = cse.astype(x.dtype) + sse.astype(x.dtype)
    o_ref[0] = x * gate


def _pick_hw_tile(hw_pad, c, itemsize, block_bytes=_BLOCK_BYTES):
    """Largest multiple of 128 dividing hw_pad with a block of ~<= block_bytes.

    hw_pad must already be a multiple of 128.  No artificial lane cap: the
    tile is sized purely from the byte budget.
    """
    budget_lanes = max(128, (block_bytes // max(1, itemsize * c)) // 128 * 128)
    best, t = 128, 128
    limit = min(hw_pad, budget_lanes)
    while t <= limit:
        if hw_pad % t == 0:
            best = t
        t += 128
    return best


def scse_forward(x_nchw, params, *, hw_tile=None,
                 fused_slab_bytes=_FUSED_SLAB_BYTES, block_bytes=_BLOCK_BYTES):
    """SCSEModule.forward: x_nchw (N, C, H, W) -> (N, C, H, W)."""
    w1, b1, w2, b2, ws, bs = params
    N, C, H, W = x_nchw.shape
    HW = H * W
    Cr = w1.shape[0]

    x = x_nchw.reshape(N, C, HW)            # contiguous reshape, no data movement
    dtype = x.dtype
    itemsize = dtype.itemsize

    # 1x1-conv weights as matrices / column-vector biases (NCHW-natural layout).
    w1_m = w1.reshape(Cr, C).astype(jnp.float32)
    b1_m = b1.reshape(Cr, 1).astype(jnp.float32)
    w2_m = w2.reshape(C, Cr).astype(jnp.float32)
    b2_m = b2.reshape(C, 1).astype(jnp.float32)
    ws_m = ws.reshape(1, C).astype(dtype)   # same dtype as x -> homogeneous MXU dot
    bs_m = bs.reshape(1, 1).astype(jnp.float32)

    # ---------------- single-pass fused path (x read once) ------------------
    slab_bytes = C * HW * itemsize
    if hw_tile is None and slab_bytes <= fused_slab_bytes:
        def full1(a):
            shp = a.shape
            return pl.BlockSpec(shp, lambda n: (0,) * len(shp))

        x_spec = pl.BlockSpec((1, C, HW), lambda n: (n, 0, 0))
        out = pl.pallas_call(
            functools.partial(_scse_fused_kernel, inv_hw=1.0 / float(HW)),
            out_shape=jax.ShapeDtypeStruct((N, C, HW), dtype),
            grid_spec=pltpu.PrefetchScalarGridSpec(
                num_scalar_prefetch=0,
                grid=(N,),
                in_specs=[x_spec,
                          full1(w1_m), full1(b1_m), full1(w2_m), full1(b2_m),
                          full1(ws_m), full1(bs_m)],
                out_specs=x_spec,
            ),
            compiler_params=pltpu.CompilerParams(
                dimension_semantics=("parallel",),
                vmem_limit_bytes=_VMEM_LIMIT_BYTES),
        )(x, w1_m, b1_m, w2_m, b2_m, ws_m, bs_m)
        return out.reshape(N, C, H, W)

    # ---------------- two-pass fallback (large HW) ---------------------------
    # Pad HW to a multiple of 128 (zero pad): keeps blocks bounded & lane-dense;
    # zero columns do not perturb the spatial sum, and the padded output region
    # is sliced off.  The mean divides by the TRUE HW.
    HW_pad = -(-HW // 128) * 128
    x_p = jnp.pad(x, ((0, 0), (0, 0), (0, HW_pad - HW))) if HW_pad != HW else x

    if hw_tile is None:
        hw_tile = _pick_hw_tile(HW_pad, C, itemsize, block_bytes)
    assert HW_pad % hw_tile == 0, "hw_tile must divide the padded spatial extent"
    assert hw_tile % 128 == 0 or hw_tile == HW_pad
    n_hw = HW_pad // hw_tile

    # Pass 1: spatial partial sums.  Leading 2-way "parallel" spatial split so
    # both v7x TensorCores work even for N == 1 (harmless extra grid step on
    # single-core v5e/v6e).
    n_split = 2 if (n_hw % 2 == 0 and n_hw >= 2) else 1
    n_hw_s = n_hw // n_split

    x_spec1 = pl.BlockSpec((1, C, hw_tile),
                           lambda s, n, t: (n, 0, s * n_hw_s + t))
    psum_spec = pl.BlockSpec((1, C, 1), lambda s, n, t: (s * N + n, 0, 0))

    psum = pl.pallas_call(
        _pool_kernel,
        out_shape=jax.ShapeDtypeStruct((n_split * N, C, 1), jnp.float32),
        grid_spec=pltpu.PrefetchScalarGridSpec(
            num_scalar_prefetch=0,
            grid=(n_split, N, n_hw_s),
            in_specs=[x_spec1],
            out_specs=psum_spec,
            scratch_shapes=[pltpu.VMEM((C, 1), jnp.float32)],
        ),
        compiler_params=pltpu.CompilerParams(
            dimension_semantics=("parallel", "parallel", "arbitrary"),
            vmem_limit_bytes=_VMEM_LIMIT_BYTES),
    )(x_p)

    # Tiny cSE MLP hoisted to plain JAX, batched over N (sane MXU shapes, no
    # per-grid-step weight DMAs inside the kernel).
    pooled = jnp.sum(psum[..., 0].reshape(n_split, N, C), axis=0) * (1.0 / float(HW))
    h = jnp.maximum(pooled @ w1_m.T + b1_m[:, 0], 0.0)          # (N, Cr)
    g = jax.nn.sigmoid(h @ w2_m.T + b2_m[:, 0])                 # (N, C)
    gate = g[:, :, None]                                        # (N, C, 1) f32

    # Pass 2: apply the fused cSE + sSE gates.
    def full2(a):
        shp = a.shape
        return pl.BlockSpec(shp, lambda n, t: (0,) * len(shp))

    x_spec2 = pl.BlockSpec((1, C, hw_tile), lambda n, t: (n, 0, t))
    gate_spec = pl.BlockSpec((1, C, 1), lambda n, t: (n, 0, 0))

    out = pl.pallas_call(
        _apply_kernel,
        out_shape=jax.ShapeDtypeStruct((N, C, HW_pad), dtype),
        grid_spec=pltpu.PrefetchScalarGridSpec(
            num_scalar_prefetch=0,
            grid=(N, n_hw),
            in_specs=[x_spec2, gate_spec, full2(ws_m), full2(bs_m)],
            out_specs=x_spec2,
        ),
        compiler_params=pltpu.CompilerParams(
            dimension_semantics=("parallel", "parallel"),
            vmem_limit_bytes=_VMEM_LIMIT_BYTES),
    )(x_p, gate, ws_m, bs_m)

    if HW_pad != HW:
        out = out[:, :, :HW]
    return out.reshape(N, C, H, W)


def scse_reference(x_nchw, params):
    """Plain-JAX reference mirroring the PyTorch module exactly."""
    w1, b1, w2, b2, ws, bs = params
    N, C, H, W = x_nchw.shape
    Cr = w1.shape[0]
    pooled = jnp.mean(x_nchw, axis=(2, 3))                             # (N, C)
    h = jnp.maximum(pooled @ w1.reshape(Cr, C).T + b1, 0.0)            # (N, Cr)
    cse = jax.nn.sigmoid(h @ w2.reshape(C, Cr).T + b2)                 # (N, C)
    cse = cse[:, :, None, None]
    sse = jax.nn.sigmoid(
        jnp.einsum('nchw,oc->nohw', x_nchw, ws.reshape(1, C))
        + bs.reshape(1, 1, 1, 1))
    return x_nchw * cse + x_nchw * sse


def init_params(key, in_channels, reduction=16):
    cr = max(1, in_channels // reduction)
    k1, k2, k3, k4, k5, k6 = jax.random.split(key, 6)
    w1 = 0.1 * jax.random.normal(k1, (cr, in_channels, 1, 1), jnp.float32)
    b1 = 0.1 * jax.random.normal(k2, (cr,), jnp.float32)
    w2 = 0.1 * jax.random.normal(k3, (in_channels, cr, 1, 1), jnp.float32)
    b2 = 0.1 * jax.random.normal(k4, (in_channels,), jnp.float32)
    ws = 0.1 * jax.random.normal(k5, (1, in_channels, 1, 1), jnp.float32)
    bs = 0.1 * jax.random.normal(k6, (1,), jnp.float32)
    return (w1, b1, w2, b2, ws, bs)


if __name__ == "__main__":
    key = jax.random.PRNGKey(0)
    k_x, k_p, k_x2 = jax.random.split(key, 3)

    # Main shape: reduction=16 -> hidden channels = 2.
    N, C, H, W = 2, 32, 16, 16
    x = jax.random.normal(k_x, (N, C, H, W), jnp.float32)
    params = init_params(k_p, C, reduction=16)
    ref = scse_reference(x, params)

    # 1) Auto dispatch -> single-pass fused kernel (slab fits in VMEM).
    out_fused = jax.block_until_ready(scse_forward(x, params))
    assert out_fused.shape == ref.shape
    assert jnp.max(jnp.abs(out_fused - ref)) < 1e-4, "Pallas mismatch (fused)"

    # 2) Forced two-pass with hw_tile=128: exercises the multi-tile MXU
    #    pooled-sum accumulation and the 2-way megacore spatial split.
    out_two = jax.block_until_ready(scse_forward(x, params, hw_tile=128))
    assert jnp.max(jnp.abs(out_two - ref)) < 1e-4, "Pallas mismatch (two-pass, 128)"

    # 3) Forced two-pass with auto tile (fused path disabled).
    out_two2 = jax.block_until_ready(scse_forward(x, params, fused_slab_bytes=0))
    assert jnp.max(jnp.abs(out_two2 - ref)) < 1e-4, "Pallas mismatch (two-pass, auto)"

    # 4) Ragged spatial extent (HW = 100 -> padded to 128) on the two-pass path.
    x_r = jax.random.normal(k_x2, (1, 16, 10, 10), jnp.float32)
    params_r = init_params(k_p, 16, reduction=16)
    ref_r = scse_reference(x_r, params_r)
    out_r = jax.block_until_ready(scse_forward(x_r, params_r, fused_slab_bytes=0))
    assert jnp.max(jnp.abs(out_r - ref_r)) < 1e-4, "Pallas mismatch (ragged HW)"

    print("KERNEL_OK")
</pallas_src>

<mosaic_0001>
module attributes {stable_mosaic.version = 11 : i64} {
  func.func @_scse_fused_kernel(%arg0: i32, %arg1: memref<1x32x256xf32, #tpu.memory_space<vmem>>, %arg2: memref<2x32xf32, #tpu.memory_space<vmem>>, %arg3: memref<2x1xf32, #tpu.memory_space<vmem>>, %arg4: memref<32x2xf32, #tpu.memory_space<vmem>>, %arg5: memref<32x1xf32, #tpu.memory_space<vmem>>, %arg6: memref<1x32xf32, #tpu.memory_space<vmem>>, %arg7: memref<1x1xf32, #tpu.memory_space<vmem>>, %arg8: memref<1x32x256xf32, #tpu.memory_space<vmem>>) attributes {dimension_semantics = [#tpu.dimension_semantics<parallel>], iteration_bounds = array<i64: 2>, scalar_prefetch = 0 : i64, scratch_operands = 0 : i64, tpu.core_type = #tpu.core_type<tc>, window_params = [{transform_indices = @transform_0, window_bounds = array<i64: 1, 32, 256>}, {pipeline_mode = #tpu.pipeline_mode<synchronous>, transform_indices = @transform_1, window_bounds = array<i64: 2, 32>}, {pipeline_mode = #tpu.pipeline_mode<synchronous>, transform_indices = @transform_2, window_bounds = array<i64: 2, 1>}, {pipeline_mode = #tpu.pipeline_mode<synchronous>, transform_indices = @transform_3, window_bounds = array<i64: 32, 2>}, {pipeline_mode = #tpu.pipeline_mode<synchronous>, transform_indices = @transform_4, window_bounds = array<i64: 32, 1>}, {pipeline_mode = #tpu.pipeline_mode<synchronous>, transform_indices = @transform_5, window_bounds = array<i64: 1, 32>}, {pipeline_mode = #tpu.pipeline_mode<synchronous>, transform_indices = @transform_6, window_bounds = array<i64: 1, 1>}, {transform_indices = @transform_7, window_bounds = array<i64: 1, 32, 256>}]} {
    %c0 = arith.constant 0 : index
    %c0_0 = arith.constant 0 : index
    %c0_1 = arith.constant 0 : index
    %0 = vector.load %arg1[%c0, %c0_0, %c0_1] : memref<1x32x256xf32, #tpu.memory_space<vmem>>, vector<1x32x256xf32>
    %1 = vector.shape_cast %0 : vector<1x32x256xf32> to vector<32x256xf32>
    %cst = arith.constant 1.000000e+00 : f32
    %2 = vector.broadcast %cst : f32 to vector<256x1xf32>
    %cst_2 = arith.constant dense<0.000000e+00> : vector<32x1xf32>
    %3 = tpu.matmul %1, %2, %cst_2 {dimension_numbers = #tpu.dot_dimension_numbers<[1], [0], [0], [1], [0, 0, 1, 1], [], []>} : vector<32x256xf32>, vector<256x1xf32>, vector<32x1xf32> -> vector<32x1xf32>
    %cst_3 = arith.constant 3.906250e-03 : f32
    %4 = vector.broadcast %cst_3 : f32 to vector<32x1xf32>
    %5 = arith.mulf %3, %4 : vector<32x1xf32>
    %c0_4 = arith.constant 0 : index
    %c0_5 = arith.constant 0 : index
    %6 = vector.load %arg2[%c0_4, %c0_5] : memref<2x32xf32, #tpu.memory_space<vmem>>, vector<2x32xf32>
    %cst_6 = arith.constant dense<0.000000e+00> : vector<2x1xf32>
    %7 = tpu.matmul %6, %5, %cst_6 {dimension_numbers = #tpu.dot_dimension_numbers<[1], [0], [0], [1], [0, 0, 1, 1], [], []>} : vector<2x32xf32>, vector<32x1xf32>, vector<2x1xf32> -> vector<2x1xf32>
    %c0_7 = arith.constant 0 : index
    %c0_8 = arith.constant 0 : index
    %8 = vector.load %arg3[%c0_7, %c0_8] : memref<2x1xf32, #tpu.memory_space<vmem>>, vector<2x1xf32>
    %9 = arith.addf %7, %8 : vector<2x1xf32>
    %cst_9 = arith.constant 0.000000e+00 : f32
    %10 = vector.broadcast %cst_9 : f32 to vector<2x1xf32>
    %11 = arith.maximumf %9, %10 : vector<2x1xf32>
    %c0_10 = arith.constant 0 : index
    %c0_11 = arith.constant 0 : index
    %12 = vector.load %arg4[%c0_10, %c0_11] : memref<32x2xf32, #tpu.memory_space<vmem>>, vector<32x2xf32>
    %cst_12 = arith.constant dense<0.000000e+00> : vector<32x1xf32>
    %13 = tpu.matmul %12, %11, %cst_12 {dimension_numbers = #tpu.dot_dimension_numbers<[1], [0], [0], [1], [0, 0, 1, 1], [], []>} : vector<32x2xf32>, vector<2x1xf32>, vector<32x1xf32> -> vector<32x1xf32>
    %c0_13 = arith.constant 0 : index
    %c0_14 = arith.constant 0 : index
    %14 = vector.load %arg5[%c0_13, %c0_14] : memref<32x1xf32, #tpu.memory_space<vmem>>, vector<32x1xf32>
    %15 = arith.addf %13, %14 : vector<32x1xf32>
    %16 = arith.negf %15 : vector<32x1xf32>
    %17 = math.exp %16 : vector<32x1xf32>
    %cst_15 = arith.constant 1.000000e+00 : f32
    %18 = vector.broadcast %cst_15 : f32 to vector<32x1xf32>
    %19 = arith.addf %18, %17 : vector<32x1xf32>
    %20 = arith.divf %18, %19 : vector<32x1xf32>
    %c0_16 = arith.constant 0 : index
    %c0_17 = arith.constant 0 : index
    %21 = vector.load %arg6[%c0_16, %c0_17] : memref<1x32xf32, #tpu.memory_space<vmem>>, vector<1x32xf32>
    %cst_18 = arith.constant dense<0.000000e+00> : vector<1x256xf32>
    %22 = tpu.matmul %21, %1, %cst_18 {dimension_numbers = #tpu.dot_dimension_numbers<[1], [0], [0], [1], [0, 0, 1, 1], [], []>} : vector<1x32xf32>, vector<32x256xf32>, vector<1x256xf32> -> vector<1x256xf32>
    %c0_19 = arith.constant 0 : index
    %c0_20 = arith.constant 0 : index
    %23 = vector.load %arg7[%c0_19, %c0_20] : memref<1x1xf32, #tpu.memory_space<vmem>>, vector<1x1xf32>
    %24 = vector.broadcast %23 : vector<1x1xf32> to vector<1x256xf32>
    %25 = arith.addf %22, %24 : vector<1x256xf32>
    %26 = arith.negf %25 : vector<1x256xf32>
    %27 = math.exp %26 : vector<1x256xf32>
    %cst_21 = arith.constant 1.000000e+00 : f32
    %28 = vector.broadcast %cst_21 : f32 to vector<1x256xf32>
    %29 = arith.addf %28, %27 : vector<1x256xf32>
    %30 = arith.divf %28, %29 : vector<1x256xf32>
    %31 = vector.broadcast %20 : vector<32x1xf32> to vector<32x256xf32>
    %32 = vector.broadcast %30 : vector<1x256xf32> to vector<32x256xf32>
    %33 = arith.addf %31, %32 : vector<32x256xf32>
    %34 = arith.mulf %1, %33 : vector<32x256xf32>
    %c0_22 = arith.constant 0 : index
    %c0_23 = arith.constant 0 : index
    %c0_24 = arith.constant 0 : index
    %35 = vector.load %arg8[%c0_22, %c0_23, %c0_24] : memref<1x32x256xf32, #tpu.memory_space<vmem>>, vector<1x32x256xf32>
    %36 = vector.shape_cast %35 : vector<1x32x256xf32> to vector<32x256xf32>
    %37 = vector.shape_cast %34 : vector<32x256xf32> to vector<1x32x256xf32>
    tpu.vector_store %arg8[%c0_22, %c0_23, %c0_24], %37 {strides = array<i32>} : memref<1x32x256xf32, #tpu.memory_space<vmem>>, vector<1x32x256xf32>,
    return
  }
  func.func @transform_0(%arg0: i32) -> (i32, i32, i32) {
    %c0_i32 = arith.constant 0 : i32
    %c0_i32_0 = arith.constant 0 : i32
    %c0_i32_1 = arith.constant 0 : i32
    return %arg0, %c0_i32, %c0_i32_0 : i32, i32, i32
  }
  func.func @transform_1(%arg0: i32) -> (i32, i32) {
    %c0_i32 = arith.constant 0 : i32
    %c0_i32_0 = arith.constant 0 : i32
    %c0_i32_1 = arith.constant 0 : i32
    return %c0_i32, %c0_i32_0 : i32, i32
  }
  func.func @transform_2(%arg0: i32) -> (i32, i32) {
    %c0_i32 = arith.constant 0 : i32
    %c0_i32_0 = arith.constant 0 : i32
    %c0_i32_1 = arith.constant 0 : i32
    return %c0_i32, %c0_i32_0 : i32, i32
  }
  func.func @transform_3(%arg0: i32) -> (i32, i32) {
    %c0_i32 = arith.constant 0 : i32
    %c0_i32_0 = arith.constant 0 : i32
    %c0_i32_1 = arith.constant 0 : i32
    return %c0_i32, %c0_i32_0 : i32, i32
  }
  func.func @transform_4(%arg0: i32) -> (i32, i32) {
    %c0_i32 = arith.constant 0 : i32
    %c0_i32_0 = arith.constant 0 : i32
    %c0_i32_1 = arith.constant 0 : i32
    return %c0_i32, %c0_i32_0 : i32, i32
  }
  func.func @transform_5(%arg0: i32) -> (i32, i32) {
    %c0_i32 = arith.constant 0 : i32
    %c0_i32_0 = arith.constant 0 : i32
    %c0_i32_1 = arith.constant 0 : i32
    return %c0_i32, %c0_i32_0 : i32, i32
  }
  func.func @transform_6(%arg0: i32) -> (i32, i32) {
    %c0_i32 = arith.constant 0 : i32
    %c0_i32_0 = arith.constant 0 : i32
    %c0_i32_1 = arith.constant 0 : i32
    return %c0_i32, %c0_i32_0 : i32, i32
  }
  func.func @transform_7(%arg0: i32) -> (i32, i32, i32) {
    %c0_i32 = arith.constant 0 : i32
    %c0_i32_0 = arith.constant 0 : i32
    %c0_i32_1 = arith.constant 0 : i32
    return %arg0, %c0_i32, %c0_i32_0 : i32, i32, i32
  }
}

</mosaic_0001>

<bundles_post_ra>
// kernel: tpu_custom_call.1
= control target key start
LH: loop header
LB: loop body
LE: loop exit
PB: predicated region body
PF: predicated region fallthrough
CT: control target
= control target key end

     0   :  { %s1905_s0 = inlined_call_operand.hbm [shape: f32[2,32,256], index: 0, kind: input, shape index: {}]   ;;  %s1906_s1 = inlined_call_operand.hbm [shape: f32[2,32], index: 1, kind: input, shape index: {}]   ;;  %s1907_s2 = inlined_call_operand.hbm [shape: f32[2,1], index: 2, kind: input, shape index: {}]   ;;  %s1908_s3 = inlined_call_operand.hbm [shape: f32[32,2], index: 3, kind: input, shape index: {}]   ;;  %s1909_s4 = inlined_call_operand.hbm [shape: f32[32,1], index: 4, kind: input, shape index: {}]   ;;  %s1910_s5 = inlined_call_operand.hbm [shape: f32[1,32], index: 5, kind: input, shape index: {}]   ;;  %s1911_s6 = inlined_call_operand.<no memory space> [shape: f32[1,1], index: 6, kind: input, shape index: {}]   ;;  %s1912_s7 = inlined_call_operand.hbm [shape: f32[2,32,256], index: 7, kind: output, shape index: {}]  }
   0x1   :  { %v12_v0 = vstv %s1911_s6 }
   0x2   :  { %13 = vst [vmem:[#allocation2] sm:$0x1] %v12_v0 }
   0x3   :  { %14 = vsyncpa [#allocation4], 0 }
   0x4   :  { %16 = vsyncpa [#allocation4 + $0x1], 0 }
   0x5   :  { %17 = vsyncpa [#allocation7], 0 }
   0x6   :  { %18 = vsyncpa [#allocation10], 0 }
   0x7   :  { %19 = vsyncpa [#allocation13], 0 }
   0x8   :  { %20 = vsyncpa [#allocation5], 0 }
   0x9   :  { %22 = vsyncpa [#allocation5 + $0x1], 0  ;;  %s1545_s26 = smov 0   ;;  %s1547_s27 = smov 0  }
   0xa   :  { %s1549_s28 = smov 0   ;;  %s1551_s29 = smov 0  }
   0xb LB: > { %s1484_s6 = smov [#allocation6]   ;;  %s1566_s8 = sadd.s32 4294967295, %s1482_s29   ;;  %s1482_s29 = sphi %s1551_s29, %s1937_s29   ;;  %s1478_s28 = sphi %s1549_s28, %s1936_s28   ;;  %s1474_s27 = sphi %s1547_s27, %s1935_s27   ;;  %s1470_s26 = sphi %s1545_s26, %s1934_s26  }
   0xc   : > { %s224_s30 = sshll.u32 %s1484_s6, 4  ;;  %p959_p0 = scmp.ge.s32.totalorder %s1482_s29, 1  ;;  %s225_s30 = int_to_ptr.vmem [resolvable:$true] %s224_s30 }
   0xd   : > { %p1913_p1 = scmp.eq.s32.totalorder %s1566_s8, 0  ;;  %p211_p2 = scmp.lt.s32.totalorder %s1482_s29, 3 }
   0xe   : > { %s1485_s10 = smov [#allocation9]   ;;  %s1486_s13 = smov [#allocation8]  }
   0xf   : > { %p1571_p3 = pnand %p959_p0, %p211_p2  ;;  %s245_s11 = sshll.u32 %s1485_s10, 4  ;;  %s1578_s11 = int_to_ptr.vmem [resolvable:$true] %s245_s11 }
  0x10   : > { %s235_s14 = sshll.u32 %s1486_s13, 4  ;;  %s1234_s17 = scalar_lea.hbm %s1906_s1, 32  ;;  %s1586_s14 = int_to_ptr.vmem [resolvable:$true] %s235_s14 }
  0x11   : > { %s1916_s9 = scalar_select %p1571_p3, 1, 0 }
  0x12   : > { %p1124_p5 = pneg %p1571_p3  ;;  %p1235_p7 = scmp.ne.s32.totalorder %s1906_s1, %s1234_s17 }
  0x13   : > { %p1241_p11 = scmp.lt.u32.totalorder %s1234_s17, %s1906_s1 }
  0x14   : > { %p1582_p6 = pnand %p1124_p5, %p1913_p1 }
  0x16   : > { %p1596_p8 = pneg %p1582_p6 }
  0x18   : > { %p1237_p9 = pnand %p1596_p8, %p1235_p7 }
  0x1a   : > { %p1238_p10 = pneg %p1237_p9 }
  0x1c   : > { %p1243_p12 = pnand %p1241_p11, %p1238_p10 }
  0x1e   : > { %1246 = shalt.err (!%p1243_p12)
}
  0x1f   : > { %s1247_s23 = scalar_lea.vmem %s225_s30, 32  ;;  %p1255_p5 = scmp.lt.s32.totalorder %s225_s30, %s225_s30 }
  0x20   : > { %p1248_p13 = scmp.ne.s32.totalorder %s225_s30, %s1247_s23  ;;  %p1256_p4 = scmp.lt.s32.totalorder %s1247_s23, %s1247_s23 }
  0x22   : > { %p1250_p0 = pnand %p1248_p13, %p1596_p8  ;;  %p1257_p1 = por %p1256_p4, %p1255_p5 }
  0x24   : > { %p1251_p2 = pneg %p1250_p0 }
  0x26   : > { %p1258_p3 = pnand %p1257_p1, %p1251_p2 }
  0x28   : > { %1261 = shalt.err (!%p1258_p3)
}
  0x29   : > { %1127 = dma.hbm_to_vmem [thread:$0]  (!%p1582_p6), %s1906_s1, 32, %s225_s30, [#allocation7]  }
  0x2a   : > { %s1262_s13 = scalar_lea.hbm %s1908_s3, 512 }
  0x2b   : > { %p1263_p7 = scmp.ne.s32.totalorder %s1908_s3, %s1262_s13  ;;  %p1269_p1 = scmp.lt.u32.totalorder %s1262_s13, %s1908_s3 }
  0x2d   : > { %p1265_p9 = pnand %p1263_p7, %p1596_p8 }
  0x2f   : > { %p1266_p4 = pneg %p1265_p9 }
  0x31   : > { %p1271_p3 = pnand %p1269_p1, %p1266_p4 }
  0x33   : > { %1274 = shalt.err (!%p1271_p3)
}
  0x34   : > { %s1275_s30 = scalar_lea.vmem %s1578_s11, 512  ;;  %p1283_p13 = scmp.lt.s32.totalorder %s1578_s11, %s1578_s11 }
  0x35   : > { %p1276_p10 = scmp.ne.s32.totalorder %s1578_s11, %s1275_s30  ;;  %p1284_p0 = scmp.lt.s32.totalorder %s1275_s30, %s1275_s30 }
  0x37   : > { %p1278_p11 = pnand %p1276_p10, %p1596_p8  ;;  %p1285_p2 = por %p1284_p0, %p1283_p13 }
  0x39   : > { %p1279_p12 = pneg %p1278_p11 }
  0x3b   : > { %p1286_p5 = pnand %p1285_p2, %p1279_p12 }
  0x3d   : > { %1289 = shalt.err (!%p1286_p5)
}
  0x3e   : > { %s1487_s19 = smov 128   ;;  %s1488_s21 = smov 8  }
  0x3f   : > { %1133 = dma.hbm_to_vmem [thread:$0]  (!%p1582_p6), %s1908_s3, 512, %s1578_s11, [#allocation10], %s1487_s19, %s1487_s19, %s1488_s21  }
  0x40   : > { %s1290_s6 = scalar_lea.hbm %s1907_s2, 32 }
  0x41   : > { %p1291_p7 = scmp.ne.s32.totalorder %s1907_s2, %s1290_s6  ;;  %p1297_p1 = scmp.lt.u32.totalorder %s1290_s6, %s1907_s2 }
  0x43   : > { %p1293_p9 = pnand %p1291_p7, %p1596_p8 }
  0x45   : > { %p1294_p4 = pneg %p1293_p9 }
  0x47   : > { %p1299_p3 = pnand %p1297_p1, %p1294_p4 }
  0x49   : > { %1302 = shalt.err (!%p1299_p3)
}
  0x4a   : > { %s1303_s11 = scalar_lea.vmem %s1586_s14, 32  ;;  %p1311_p13 = scmp.lt.s32.totalorder %s1586_s14, %s1586_s14 }
  0x4b   : > { %p1304_p10 = scmp.ne.s32.totalorder %s1586_s14, %s1303_s11  ;;  %p1312_p0 = scmp.lt.s32.totalorder %s1303_s11, %s1303_s11 }
  0x4d   : > { %p1306_p11 = pnand %p1304_p10, %p1596_p8  ;;  %p1313_p2 = por %p1312_p0, %p1311_p13 }
  0x4f   : > { %p1307_p12 = pneg %p1306_p11 }
  0x51   : > { %p1314_p5 = pnand %p1313_p2, %p1307_p12 }
  0x53   : > { %1317 = shalt.err (!%p1314_p5)
}
  0x54   : > { %1130 = dma.hbm_to_vmem [thread:$0]  (!%p1582_p6), %s1907_s2, 32, %s1586_s14, [#allocation7]  }
  0x55   : > { %s1489_s30 = smov [#allocation11]   ;;  %s1490_s23 = smov [#allocation12]  }
  0x56   : > { %s258_s22 = sshll.u32 %s1489_s30, 4  ;;  %s272_s24 = sshll.u32 %s1490_s23, 4  ;;  %s259_s22 = int_to_ptr.vmem [resolvable:$true] %s258_s22  ;;  %s273_s24 = int_to_ptr.vmem [resolvable:$true] %s272_s24 }
  0x57   : > { %s1318_s10 = scalar_lea.hbm %s1909_s4, 512 }
  0x58   : > { %p1319_p7 = scmp.ne.s32.totalorder %s1909_s4, %s1318_s10  ;;  %p1325_p1 = scmp.lt.u32.totalorder %s1318_s10, %s1909_s4 }
  0x5a   : > { %p1321_p9 = pnand %p1319_p7, %p1596_p8 }
  0x5c   : > { %p1322_p4 = pneg %p1321_p9 }
  0x5e   : > { %p1327_p3 = pnand %p1325_p1, %p1322_p4 }
  0x60   : > { %1330 = shalt.err (!%p1327_p3)
}
  0x61   : > { %s1331_s14 = scalar_lea.vmem %s259_s22, 512  ;;  %p1339_p13 = scmp.lt.s32.totalorder %s259_s22, %s259_s22 }
  0x62   : > { %p1332_p10 = scmp.ne.s32.totalorder %s259_s22, %s1331_s14  ;;  %p1340_p0 = scmp.lt.s32.totalorder %s1331_s14, %s1331_s14 }
  0x64   : > { %p1334_p11 = pnand %p1332_p10, %p1596_p8  ;;  %p1341_p2 = por %p1340_p0, %p1339_p13 }
  0x66   : > { %p1335_p12 = pneg %p1334_p11 }
  0x68   : > { %p1342_p5 = pnand %p1341_p2, %p1335_p12 }
  0x6a   : > { %1345 = shalt.err (!%p1342_p5)
}
  0x6b   : > { %1136 = dma.hbm_to_vmem [thread:$0]  (!%p1582_p6), %s1909_s4, 512, %s259_s22, [#allocation10], %s1487_s19, %s1487_s19, %s1488_s21  }
  0x6c   : > { %s1346_s25 = scalar_lea.hbm %s1910_s5, 16 }
  0x6d   : > { %p1347_p7 = scmp.ne.s32.totalorder %s1910_s5, %s1346_s25  ;;  %p1353_p1 = scmp.lt.u32.totalorder %s1346_s25, %s1910_s5 }
  0x6f   : > { %p1349_p9 = pnand %p1347_p7, %p1596_p8 }
  0x71   : > { %p1350_p4 = pneg %p1349_p9 }
  0x73   : > { %p1355_p3 = pnand %p1353_p1, %p1350_p4 }
  0x75   : > { %1358 = shalt.err (!%p1355_p3)
}
  0x76   : > { %s1359_s16 = scalar_lea.vmem %s273_s24, 16  ;;  %s1366_s19 = scalar_lea.vmem %s273_s24, 32 }
  0x77   : > { %p1360_p10 = scmp.ne.s32.totalorder %s273_s24, %s1359_s16  ;;  %p1367_p13 = scmp.lt.s32.totalorder %s273_s24, %s273_s24 }
  0x78   : > { %p1368_p0 = scmp.lt.s32.totalorder %s1366_s19, %s1359_s16 }
  0x79   : > { %p1362_p11 = pnand %p1360_p10, %p1596_p8 }
  0x7a   : > { %p1369_p2 = por %p1368_p0, %p1367_p13 }
  0x7b   : > { %p1363_p12 = pneg %p1362_p11 }
  0x7d   : > { %p1370_p5 = pnand %p1369_p2, %p1363_p12 }
  0x7f   : > { %1373 = shalt.err (!%p1370_p5)
}
  0x80   : > { %1139 = dma.hbm_to_vmem [thread:$0]  (!%p1582_p6), %s1910_s5, 16, %s273_s24, [#allocation13]  }
  0x81   : > { %s958_s20 = sadd.s32 4294967294, %s1482_s29   ;;  %s1702_s12 = sadd.s32 1, %s1482_s29  }
  0x82   : > { %s35_s11 = sadd.s32 1, %s1478_s28  ;;  %s32_s14 = ssub.s32 %s1482_s29, %s1702_s12 }
  0x83   : > { %p42_p8 = scmp.ne.s32.totalorder %s1478_s28, %s1474_s27  ;;  %p33_p7 = scmp.eq.s32.totalorder %s32_s14, 0 }
  0x84   : > { %p43_p9 = scmp.eq.s32.totalorder %s1482_s29, 0  ;;  %p48_p4 = scmp.ne.s32.totalorder %s1474_s27, %s1470_s26 }
  0x85   : > { %p198_p1 = scmp.eq.s32.totalorder %s1566_s8, 1  ;;  %p1919_p10 = scmp.eq.s32.totalorder %s1566_s8, 0 }
  0x86   : > { %s1714_s17 = scalar_select %p33_p7, %s1478_s28, %s35_s11  }
  0x87   : > { %p44_p3 = por %p43_p9, %p42_p8  ;;  %p1718_p11 = por %p1919_p10, %p48_p4 }
  0x88   : > { %p1722_p6 = por %p198_p1, %p42_p8  ;;  %p204_p12 = scmp.eq.s32.totalorder %s958_s20, 1 }
  0x89   : > { %p1153_p13 = scmp.lt.s32.totalorder %s1482_s29, 2  ;;  %s286_s30 = sand.u32 1, %s1478_s28  }
  0x8a   : > { %s1921_s24 = scalar_select %p1722_p6, 1, 0 }
  0x8b   : > { %p1728_p0 = por %p204_p12, %p48_p4  ;;  %s966_s25 = sshll.u32 %s286_s30, 6 }
  0x8c   : > { %s995_s6 = sshll.u32 %s1482_s29, 10  ;;  %s290_s16 = scalar_lea.vmem [#allocation3], %s966_s25 }
  0x8d   : > { %s1922_s23 = scalar_select %p1728_p0, 1, 0 }
  0x8e   : > { %s1736_s15 = scalar_lea.hbm %s1905_s0, %s995_s6  ;;  %s297_s19 = sshll.u32 %s290_s16, 4  ;;  %s1742_s19 = int_to_ptr.vmem [resolvable:$true] %s297_s19 }
  0x8f   : > { %p1738_p2 = pnand %p1153_p13, %p44_p3  ;;  %s1744_s22 = scalar_lea.sflag [#allocation4], %s286_s30 }
  0x90   : > { %s1374_s20 = scalar_lea.hbm %s1736_s15, 1024  ;;  %s1379_s25 = scalar_lea.hbm %s1905_s0, 2048 }
  0x91   : > { %p1375_p5 = scmp.ne.s32.totalorder %s1736_s15, %s1374_s20  ;;  %p1376_p8 = pneg %p1738_p2 }
  0x92   : > { %p1380_p4 = scmp.lt.u32.totalorder %s1736_s15, %s1905_s0  ;;  %p1381_p1 = scmp.lt.u32.totalorder %s1379_s25, %s1374_s20 }
  0x93   : > { %p1377_p7 = pnand %p1376_p8, %p1375_p5  ;;  %p1383_p10 = scmp.lt.u32.totalorder %s1374_s20, %s1736_s15 }
  0x94   : > { %p1382_p3 = por %p1381_p1, %p1380_p4 }
  0x95   : > { %p1378_p9 = pneg %p1377_p7 }
  0x96   : > { %p1384_p12 = por %p1383_p10, %p1382_p3 }
  0x98   : > { %p1385_p13 = pnand %p1384_p12, %p1378_p9 }
  0x9a   : > { %1388 = shalt.err (!%p1385_p13)
}
  0x9b   : > { %s1389_s30 = scalar_lea.vmem %s1742_s19, 1024  ;;  %s1491_s13 = smov [#allocation3]  }
  0x9c   : > { %p1390_p5 = scmp.ne.s32.totalorder %s1742_s19, %s1389_s30  ;;  %s1394_s16 = sshll.u32 %s1491_s13, 4  ;;  %s1395_s16 = int_to_ptr.vmem [resolvable:$false] %s1394_s16 }
  0x9d   : > { %s1396_s11 = scalar_lea.vmem %s1395_s16, 2048  ;;  %p1397_p6 = scmp.lt.s32.totalorder %s1742_s19, %s1395_s16 }
  0x9e   : > { %p1392_p7 = pnand %p1390_p5, %p1376_p8  ;;  %p1398_p4 = scmp.lt.s32.totalorder %s1396_s11, %s1389_s30 }
  0xa0   : > { %p1393_p0 = pneg %p1392_p7  ;;  %p1399_p1 = por %p1398_p4, %p1397_p6 }
  0xa2   : > { %p1400_p3 = pnand %p1399_p1, %p1393_p0 }
  0xa4   : > { %1403 = shalt.err (!%p1400_p3)
}
  0xa5   : > { %s1492_s20 = smov 256   ;;  %s1493_s14 = smov 16  }
  0xa6   : > { %1143 = dma.hbm_to_vmem [thread:$0]  (!%p1738_p2), %s1736_s15, 1024, %s1742_s19, %s1744_s22, %s1492_s20, %s1492_s20, %s1493_s14  }
  0xa7   : > { %p1924_p8 = scmp.ne.s32.totalorder %s1916_s9, 0 }
  0xa8   : > { %s1775_s25 = sand.u32 (!%p1924_p8), 1, %s1474_s27  }
  0xa9   : > { %309 = sbr.rel (%p1924_p8) target bundleno = 1065 (0x429), region = 48  ;;  %s970_s6 = sshll.u32 (!%p1924_p8), %s1775_s25, 6 }
  0xaa   : > { %s312_s10 = scalar_lea.sflag (!%p1924_p8), [#allocation4], %s1775_s25  ;;  %s1781_s30 = scalar_lea.vmem (!%p1924_p8), [#allocation3], %s970_s6 }
  0xb0   : > { %1449 = dma.done.wait (%p1718_p11), %s312_s10, 1024  }
  0xb1   : > { %1451 = vsyncadd (%p1718_p11), %s312_s10, 4294966272  ;;  %p1925_p6 = scmp.eq.s32.totalorder %s1566_s8, 0 }
  0xb3   : > { %1453 = dma.done.wait (%p1925_p6), [#allocation7], 64   ;;  %p1926_p0 = pmov %p1925_p6 }
  0xb5   : > { %1455 = vsyncadd (%p1926_p0), [#allocation7], 4294967232  ;;  %p1927_p2 = pmov %p1926_p0 }
  0xb6   : > { %p1928_p9 = pmov %p1926_p0 }
  0xb7   : > { %1457 = dma.done.wait (%p1927_p2), [#allocation10], 1024  }
  0xb8   : > { %1459 = vsyncadd (%p1928_p9), [#allocation10], 4294966272  ;;  %p1929_p10 = pmov %p1926_p0 }
  0xb9   : > { %p1930_p12 = pmov %p1926_p0 }
  0xba   : > { %1461 = dma.done.wait (%p1929_p10), [#allocation13], 16  }
  0xbb   : > { %1463 = vsyncadd (%p1930_p12), [#allocation13], 4294967280  ;;  %v1494_v1 = vmov 1.0|1.0   ;;  %v1800_v2 = vld [vmem:[%s1781_s30 + $0x8] sm:$0xff]  ;;  %v1804_v3 = vld [vmem:[%s1781_s30] sm:$0xff] }
  0xbc   : > { %1070 = vmatprep.subr.bf16.mxu0 %v1494_v1  ;;  %438 = vmatprep.mubr.f32.mxu0 %v1800_v2  ;;  %v1807_v4 = vld [vmem:[%s1781_s30 + $0x18] sm:$0xff]  ;;  %v1812_v5 = vld [vmem:[%s1781_s30 + $0x10] sm:$0xff]  ;;  %v1815_v6 = vld [vmem:[%s1781_s30 + $0x28] sm:$0xff]  ;;  %v1495_v10 = vmov 0.0|0.0   ;;  %vm1496_vm0 = vmmov 0   ;;  %v1497_v11 = vmov 0.0  }
  0xbd   : > { %1071 = vmatpush3.bf16.msra.mxu0 %v1494_v1  ;;  %v1820_v7 = vld [vmem:[%s1781_s30 + $0x20] sm:$0xff]  ;;  %v1823_v8 = vld [vmem:[%s1781_s30 + $0x38] sm:$0xff]  ;;  %v1828_v9 = vld [vmem:[%s1781_s30 + $0x30] sm:$0xff]  ;;  %1086 = vmatprep.subr.bf16.mxu1 %v1495_v10  ;;  %vm465_vm1 = vcmask 261120   ;;  %vm548_vm2 = vcmask 15360   ;;  %v1498_v33 = vmov 0   ;;  %v1092_v39 = vpack.c.bf16 %v1807_v4, %v1800_v2 }
  0xbe   : > { %1072 = vmatprep.subr.bf16.mxu0 %v1494_v1  ;;  %1059 = vmatprep.mubr.msk.f32.mxu1 %vm1496_vm0, %v1497_v11  ;;  %v463_v30 = vld [vmem:[#allocation6] sm:$0x3]  ;;  %v540_v31 = vld [vmem:[#allocation9] sm:$0xff]  ;;  %v675_v32 = vld [vmem:[#allocation2] sm:$0x1]  ;;  %vm561_vm3 = vcmask 1041408   ;;  %v1094_v40 = vpack.c.bf16 %v1812_v5, %v1804_v3  ;;  %v1096_v43 = vpack.c.bf16 %v1823_v8, %v1815_v6  ;;  %v1098_v44 = vpack.c.bf16 %v1828_v9, %v1820_v7 }
  0xbf   : > { %1208 = vset.pattern.permute.xlu0 %v1498_v33  ;;  %1209 = vset.pattern.permute.xlu1 %v1498_v33  ;;  %v464_v34 = vld [vmem:[#allocation8] sm:$0x3]  ;;  %v541_v41 = vld [vmem:[#allocation9 + $0x8] sm:$0xff]  ;;  %v542_v42 = vld [vmem:[#allocation9 + $0x10] sm:$0xff]  ;;  %s996_s9 = sshll.u32 %s1566_s8, 10  ;;  %s365_s18 = scalar_lea.vmem [#allocation14], %s970_s6 }
  0xc0   : > { %678 = vperm.xlu0 %1208, %v675_v32   ;;  %v543_v45 = vld [vmem:[#allocation9 + $0x18] sm:$0xff]  ;;  %v674_v46 = vld [vmem:[#allocation12] sm:$0x1]  ;;  %v545_v47 = vld [vmem:[#allocation11 + $0x8] sm:$0xff]  ;;  %s837_s15 = sshll.u32 %s365_s18, 4  ;;  %s1855_s22 = scalar_lea.hbm %s1912_s7, %s996_s9  ;;  %s1857_s15 = int_to_ptr.vmem [resolvable:$true] %s837_s15 }
  0xc1   : > { %1073 = vmatpush3.bf16.msra.mxu0 %v1494_v1  ;;  %v544_v48 = vld [vmem:[#allocation11] sm:$0xff]  ;;  %v547_v53 = vld [vmem:[#allocation11 + $0x18] sm:$0xff]  ;;  %v546_v55 = vld [vmem:[#allocation11 + $0x10] sm:$0xff]  ;;  %s824_s8 = scalar_lea.sflag [#allocation5], %s1775_s25  ;;  %s1404_s13 = scalar_lea.vmem %s1857_s15, 1024 }
  0xc2   : > { %1074 = vmatprep.subr.bf16.mxu0 %v1494_v1  ;;  %p1405_p11 = scmp.ne.s32.totalorder %s1857_s15, %s1404_s13  ;;  %p1931_p13 = scmp.ne.s32.totalorder %s1921_s24, 0 }
  0xc3   : > { %s1499_s16 = smov [#allocation14]  }
  0xc4   : > { %p1406_p5 = pnand %p1405_p11, %p1931_p13  ;;  %s1408_s11 = sshll.u32 %s1499_s16, 4  ;;  %s1409_s11 = int_to_ptr.vmem [resolvable:$false] %s1408_s11 }
  0xc5   : > { %1075 = vmatpush3.bf16.msra.mxu0 %v1494_v1  ;;  %s1410_s20 = scalar_lea.vmem %s1409_s11, 2048  ;;  %p1411_p4 = scmp.lt.s32.totalorder %s1857_s15, %s1409_s11 }
  0xc6   : > { %1076 = vmatprep.subr.bf16.mxu0 %v1494_v1  ;;  %p1407_p7 = pneg %p1406_p5  ;;  %p1412_p1 = scmp.lt.s32.totalorder %s1410_s20, %s1404_s13 }
  0xc8   : > { %p1413_p3 = por %p1412_p1, %p1411_p4 }
  0xc9   : > { %1077 = vmatpush3.bf16.msra.mxu0 %v1494_v1 }
  0xca   : > { %1078 = vmatprep.subr.bf16.mxu0 %v1494_v1  ;;  %p1414_p8 = pnand %p1413_p3, %p1407_p7 }
  0xcd   : > { %1079 = vmatpush3.bf16.msra.mxu0 %v1494_v1 }
  0xce   : > { %1080 = vmatprep.subr.bf16.mxu0 %v1494_v1 }
  0xd1   : > { %1081 = vmatpush3.bf16.msra.mxu0 %v1494_v1 }
  0xd2   : > { %1082 = vmatprep.subr.bf16.mxu0 %v1494_v1 }
  0xd5   : > { %1083 = vmatpush3.bf16.msra.mxu0 %v1494_v1 }
  0xd6   : > { %1084 = vmatprep.subr.bf16.mxu0 %v1494_v1 }
  0xd9   : > { %1085 = vmatpush3.bf16.msra.mxu0 %v1494_v1 }
  0xdc   : > { %439 = vmatmul.mubr.f32.vlgmr.msra.gmra.mrb[0].mxu0 %v1804_v3 }
  0xdd   : > { %443 = vmatprep.mubr.f32.mxu0 %v1807_v4 }
  0xe0   : > { %444 = vmatmul.mubr.f32.gmra.mrb[2].mxu0 %v1812_v5 }
  0xe1   : > { %448 = vmatprep.mubr.f32.mxu0 %v1815_v6 }
  0xe4   : > { %449 = vmatmul.mubr.f32.gmra.mrb[4].mxu0 %v1820_v7 }
  0xe5   : > { %453 = vmatprep.mubr.f32.mxu0 %v1823_v8 }
  0xe8   : > { %454 = vmatmul.mubr.f32.gmra.mrb[6].mxu0 %v1828_v9 }
 0x1af   : > { %v1029_v12 = vpop.f32.mrb[0].mxu0 }
 0x1b0   : > { %v1030_v13 = vpop.f32.mrb[1].mxu0 }
 0x1b1   : > { %v1031_v14 = vadd.f32 %v1030_v13, %v1029_v12 }
 0x1b3   : > { %v1032_v15 = vpop.f32.mrb[2].mxu0  ;;  %v459_v18 = vmul.f32 0.00390625, %v1031_v14 }
 0x1b4   : > { %v1033_v16 = vpop.f32.mrb[3].mxu0 }
 0x1b5   : > { %v1034_v17 = vadd.f32 %v1033_v16, %v1032_v15 }
 0x1b7   : > { %v460_v19 = vmul.f32 0.00390625, %v1034_v17  ;;  %v1035_v20 = vpop.f32.mrb[4].mxu0 }
 0x1b8   : > { %v1036_v21 = vpop.f32.mrb[5].mxu0 }
 0x1b9   : > { %v1037_v22 = vadd.f32 %v1036_v21, %v1035_v20  ;;  %v1087_v23 = vpack.c.bf16 %v460_v19, %v459_v18  ;;  %v681_v21 = vlaneseq }
 0x1bb   : > { %v1038_v24 = vpop.f32.mrb[6].mxu0  ;;  %1088 = vmatpush3.bf16.msra.mxu1 %v1087_v23  ;;  %v461_v27 = vmul.f32 0.00390625, %v1037_v22  ;;  %v682_v22 = vshrl.u32 %v681_v21, 7 }
 0x1bc   : > { %v1039_v25 = vpop.f32.mrb[7].mxu0  ;;  %1089 = vmatprep.subr.bf16.mxu1 %v1495_v10 }
 0x1bd   : > { %v1040_v26 = vadd.f32 %v1039_v25, %v1038_v24  ;;  %v683_v23 = vsub.s32 0, %v682_v22  ;;  %v679_v24 = vpop.permute.xlu0 %678 }
 0x1bf   : > { %v462_v28 = vmul.f32 0.00390625, %v1040_v26  ;;  %v684_v25 = vrot.slane %v679_v24, %v683_v23 }
 0x1c1   : > { %v1090_v29 = vpack.c.bf16 %v462_v28, %v461_v27 }
 0x1c3   : > { %1091 = vmatpush3.bf16.msra.mxu1 %v1090_v29 }
 0x1c6   : > { %1060 = vmatmul.mubr.msk.f32.vlgmr.msra.gmra.mrb[0].mxu1 %vm465_vm1, %v463_v30 }
 0x1c7   : > { %1064 = vmatprep.mubr.msk.f32.mxu1 %vm548_vm2, %v540_v31 }
 0x299   : > { %v535_v35 = vpop.f32.mrb[0].mxu1 }
 0x29a   : > { %v536_v36 = vadd.f32 %v535_v35, %v464_v34  ;;  %v1061_v37 = vpop.f32.mrb[1].mxu1 }
 0x29c   : > { %v539_v38 = vmax.f32 %v536_v36, 0.0 }
 0x29e   : > { %1062 = vmatprep.subr.msk.mxu1 %vm561_vm3, %v539_v38 }
 0x29f   : > { %1063 = vmatpush3.msk.msra.mxu1 %vm561_vm3, %v539_v38 }
 0x2a0   : > { %1065 = vmatmul.mubr.msk.f32.vlgmr.msra.gmra.mrb[2].mxu1 %vm548_vm2, %v541_v41  ;;  %1093 = vmatprep.subr.bf16.mxu1 %v1092_v39 }
 0x2a1   : > { %1067 = vmatprep.mubr.msk.f32.mxu1 %vm548_vm2, %v542_v42  ;;  %1095 = vmatpush1.bf16.msra.mxu1 %v1094_v40 }
 0x2a2   : > { %1097 = vmatprep.subr.bf16.mxu1 %v1096_v43 }
 0x2a4   : > { %1068 = vmatmul.mubr.msk.f32.gmra.mrb[4].mxu1 %vm548_vm2, %v543_v45 }
 0x2a5   : > { %1099 = vmatpush1.bf16.msra.mxu1 %v1098_v44  ;;  %752 = vmatprep.mubr.f32.mxu1 %v1497_v11 }
 0x2a8   : > { %987 = vmatmul.mubr.msk.f32.vlgmr.msra.gmra.mrb[6].mxu1 %vm465_vm1, %v674_v46 }
 0x373   : > { %v1066_v49 = vpop.f32.mrb[2].mxu1 }
 0x374   : > { %v637_v50 = vadd.f32 %v1066_v49, %v545_v47  ;;  %v631_v51 = vpop.f32.mrb[3].mxu1 }
 0x375   : > { %v632_v52 = vadd.f32 %v631_v51, %v544_v48 }
 0x376   : > { %v984_v54 = vmul.f32 -1.442695, %v637_v50 }
 0x377   : > { %v983_v56 = vmul.f32 -1.442695, %v632_v52  ;;  %v1069_v57 = vpop.f32.mrb[4].mxu1 }
 0x378   : > { %1210 = vpow2.f32 %v984_v54  ;;  %v647_v58 = vadd.f32 %v1069_v57, %v547_v53  ;;  %v641_v59 = vpop.f32.mrb[5].mxu1 }
 0x379   : > { %1212 = vpow2.f32 %v983_v56  ;;  %v642_v60 = vadd.f32 %v641_v59, %v546_v55 }
 0x37a   : > { %v986_v61 = vmul.f32 -1.442695, %v647_v58 }
 0x37b   : > { %v985_v62 = vmul.f32 -1.442695, %v642_v60  ;;  %v754_v63 = vpop.f32.mrb[6].mxu1 }
 0x37c   : > { %1214 = vpow2.f32 %v986_v61  ;;  %v756_v0 = vpop.f32.mrb[7].mxu1  ;;  %v755_v26 = vadd.f32 %v754_v63, %v684_v25 }
 0x37d   : > { %1216 = vpow2.f32 %v985_v62  ;;  %v757_v27 = vadd.f32 %v756_v0, %v684_v25 }
 0x37e   : > { %v988_v28 = vmul.f32 -1.442695, %v755_v26 }
 0x37f   : > { %v989_v29 = vmul.f32 -1.442695, %v757_v27 }
 0x382   : > { %v1211_v1 = vpop.eup %1210 }
 0x383   : > { %v1213_v10 = vpop.eup %1212  ;;  %v663_v11 = vadd.f32 1.0, %v1211_v1 }
 0x384   : > { %v662_v12 = vadd.f32 1.0, %v1213_v10 }
 0x385   : > { %1218 = vrcp.f32 %v663_v11 }
 0x386   : > { %v1215_v13 = vpop.eup %1214  ;;  %1220 = vrcp.f32 %v662_v12 }
 0x387   : > { %v1217_v14 = vpop.eup %1216  ;;  %v665_v15 = vadd.f32 1.0, %v1215_v13 }
 0x388   : > { %v664_v16 = vadd.f32 1.0, %v1217_v14 }
 0x389   : > { %1222 = vrcp.f32 %v665_v15 }
 0x38a   : > { %1224 = vrcp.f32 %v664_v16 }
 0x38b   : > { %1226 = vpow2.f32 %v988_v28 }
 0x38c   : > { %1228 = vpow2.f32 %v989_v29 }
 0x38f   : > { %v1219_v17 = vpop.eup %1218 }
 0x390   : > { %v1221_v18 = vpop.eup %1220  ;;  %778 = vperm.xlu1 %1209, %v1219_v17  }
 0x391   : > { %773 = vperm.xlu0 %1208, %v1221_v18  }
 0x393   : > { %v1223_v19 = vpop.eup %1222 }
 0x394   : > { %v1225_v20 = vpop.eup %1224 }
 0x395   : > { %783 = vperm.xlu1 %1209, %v1225_v20   ;;  %788 = vperm.xlu0 %1208, %v1223_v19   ;;  %v1227_v30 = vpop.eup %1226 }
 0x396   : > { %v1229_v31 = vpop.eup %1228  ;;  %v765_v32 = vadd.f32 1.0, %v1227_v30 }
 0x397   : > { %v766_v33 = vadd.f32 1.0, %v1229_v31 }
 0x398   : > { %1230 = vrcp.f32 %v765_v32 }
 0x399   : > { %1232 = vrcp.f32 %v766_v33 }
 0x3a2   : > { %v1231_v34 = vpop.eup %1230 }
 0x3a3   : > { %v1233_v35 = vpop.eup %1232  ;;  %v794_v36 = vrot.slane %v1231_v34, %v683_v23 }
 0x3a4   : > { %v798_v37 = vrot.slane %v1233_v35, %v683_v23 }
 0x40f   : > { %v779_v38 = vpop.permute.xlu1 %778 }
 0x410   : > { %v801_v39 = vadd.f32 %v794_v36, %v779_v38  ;;  %v802_v40 = vadd.f32 %v798_v37, %v779_v38  ;;  %v774_v41 = vpop.permute.xlu0 %773 }
 0x411   : > { %v799_v42 = vadd.f32 %v794_v36, %v774_v41  ;;  %v800_v43 = vadd.f32 %v798_v37, %v774_v41 }
 0x412   : > { %v809_v44 = vmul.f32 %v801_v39, %v1812_v5  ;;  %v810_v45 = vmul.f32 %v802_v40, %v1807_v4 }
 0x413   : > { %v807_v46 = vmul.f32 %v799_v42, %v1804_v3  ;;  %v808_v47 = vmul.f32 %v800_v43, %v1800_v2 }
 0x414   : > { %817 = vst [vmem:[%s365_s18 + $0x10] sm:$0xff] %v809_v44  ;;  %818 = vst [vmem:[%s365_s18 + $0x18] sm:$0xff] %v810_v45  ;;  %v784_v48 = vpop.permute.xlu1 %783  ;;  %v789_v49 = vpop.permute.xlu0 %788 }
 0x415   : > { %815 = vst [vmem:[%s365_s18] sm:$0xff] %v807_v46  ;;  %816 = vst [vmem:[%s365_s18 + $0x8] sm:$0xff] %v808_v47  ;;  %v803_v50 = vadd.f32 %v794_v36, %v784_v48  ;;  %v804_v51 = vadd.f32 %v798_v37, %v784_v48  ;;  %v805_v5 = vadd.f32 %v794_v36, %v789_v49 }
 0x416   : > { %v806_v4 = vadd.f32 %v798_v37, %v789_v49 }
 0x417   : > { %v811_v2 = vmul.f32 %v803_v50, %v1820_v7  ;;  %v812_v3 = vmul.f32 %v804_v51, %v1815_v6  ;;  %v813_v52 = vmul.f32 %v805_v5, %v1828_v9 }
 0x418   : > { %v814_v53 = vmul.f32 %v806_v4, %v1823_v8 }
 0x419   : > { %819 = vst [vmem:[%s365_s18 + $0x20] sm:$0xff] %v811_v2  ;;  %820 = vst [vmem:[%s365_s18 + $0x28] sm:$0xff] %v812_v3 }
 0x41a   : > { %821 = vst [vmem:[%s365_s18 + $0x30] sm:$0xff] %v813_v52  ;;  %822 = vst [vmem:[%s365_s18 + $0x38] sm:$0xff] %v814_v53 }
 0x41b   : > { %1417 = shalt.err (!%p1414_p8)
}
 0x41c   : > { %s1418_s14 = scalar_lea.hbm %s1855_s22, 1024  ;;  %s1422_s30 = scalar_lea.hbm %s1912_s7, 2048 }
 0x41d   : > { %p1419_p6 = scmp.ne.s32.totalorder %s1855_s22, %s1418_s14  ;;  %p1423_p9 = scmp.lt.u32.totalorder %s1855_s22, %s1912_s7 }
 0x41e   : > { %p1424_p10 = scmp.lt.u32.totalorder %s1422_s30, %s1418_s14  ;;  %p1426_p11 = scmp.lt.u32.totalorder %s1418_s14, %s1855_s22 }
 0x41f   : > { %p1420_p0 = pnand %p1419_p6, %p1931_p13 }
 0x420   : > { %p1425_p12 = por %p1424_p10, %p1423_p9 }
 0x421   : > { %p1421_p2 = pneg %p1420_p0 }
 0x422   : > { %p1427_p5 = por %p1426_p11, %p1425_p12 }
 0x424   : > { %p1428_p7 = pnand %p1427_p5, %p1421_p2 }
 0x426   : > { %1431 = shalt.err (!%p1428_p7)
}
 0x427   : > { %s1500_s19 = smov 256   ;;  %s1501_s21 = smov 16  }
 0x428   : > { %1122 = dma.vmem_to_hbm [thread:$0]  (%p1931_p13), %s1857_s15, 1024, %s1855_s22, %s824_s8, %s1500_s19, %s1500_s19, %s1501_s21  }
 0x429 PF: > { %s852_s13 = sand.u32 1, %s1470_s26   ;;  %p1932_p4 = scmp.ne.s32.totalorder %s1922_s23, 0 }
 0x42a   : > { %p1933_p1 = scmp.ge.s32.totalorder %s1482_s29, 2  ;;  %s853_s16 = scalar_lea.sflag [#allocation5], %s852_s13 }
 0x42c   : > { %p1145_p3 = pnand %p1933_p1, %p1932_p4 }
 0x42e   : > { %1465 = dma.done.wait (!%p1145_p3), %s853_s16, 1024  }
 0x42f   : > { %1467 = vsyncadd (!%p1145_p3), %s853_s16, 4294966272  ;;  %p25_p8 = scmp.ge.s32.totalorder %s1702_s12, 4   ;;  %s1934_s26 = smov %s1474_s27 }
 0x430   : > { %s1935_s27 = smov %s1478_s28  ;;  %s1936_s28 = smov %s1714_s17 }
 0x431   : > { %s1937_s29 = smov %s1702_s12  ;;  %27 = sbr.rel (!%p25_p8) target bundleno = 11 (0xb), region = 113 }
 0x438   :  { %858 = vsyncpa [#allocation4], 1 }
 0x439   :  { %860 = vsyncpa [#allocation4 + $0x1], 1 }
 0x43a   :  { %861 = vsyncpa [#allocation7], 1 }
 0x43b   :  { %862 = vsyncpa [#allocation10], 1 }
 0x43c   :  { %863 = vsyncpa [#allocation13], 1 }
 0x43d   :  { %864 = vsyncpa [#allocation5], 1 }
 0x43e   :  { %866 = vsyncpa [#allocation5 + $0x1], 1 }

</bundles_post_ra>
